<compile_context>
chip_gen: v7x
topology: tpu7x:2x2x1
jax: 0.10.0
libtpu: 0.0.40
codegen_flags: <defaults>
</compile_context>

<pallas_src>
import functools

import jax
import jax.numpy as jnp
from jax.experimental import pallas as pl
from jax.experimental.pallas import tpu as pltpu


def _pcc_partial_kernel(x_ref, y_ref, o_ref, *, eps):
    """Partial sum of per-row Pearson correlation coefficients for one row tile."""
    x = x_ref[...].astype(jnp.float32)               # (TN, D)
    y = y_ref[...].astype(jnp.float32)               # (TN, D)

    # Center along dim=1 (lane axis).
    xc = x - jnp.mean(x, axis=1, keepdims=True)
    yc = y - jnp.mean(y, axis=1, keepdims=True)

    # Cosine similarity per row; PyTorch clamps each norm separately by eps.
    w12 = jnp.sum(xc * yc, axis=1, keepdims=True)    # (TN, 1)
    w1 = jnp.sum(xc * xc, axis=1, keepdims=True)
    w2 = jnp.sum(yc * yc, axis=1, keepdims=True)
    n1 = jnp.maximum(jnp.sqrt(w1), eps)
    n2 = jnp.maximum(jnp.sqrt(w2), eps)
    pcc = w12 / (n1 * n2)                            # zero-padded rows -> pcc == 0

    # One partial sum per grid step (fully parallel across steps / TensorCores).
    o_ref[...] = jnp.sum(pcc, keepdims=True)         # (1, 1)


def _pick_block_rows(n, d, itemsize, *, tile_budget_bytes=16 << 20, max_rows=2048):
    """Largest row tile (multiple of 8) s.t. 2 inputs x 2 buffers x tile fits budget."""
    tn = tile_budget_bytes // (2 * 2 * d * itemsize)
    tn = max(8, min(int(tn), max_rows))
    tn -= tn % 8
    n_pad8 = ((n + 7) // 8) * 8
    return max(8, min(tn, n_pad8))


def pearson_cc_loss(inputs, targets, eps=1e-8):
    """Pallas implementation of PearsonCCLoss.forward for 2-D (N, D) inputs."""
    assert inputs.shape == targets.shape and inputs.ndim == 2
    n, d = inputs.shape
    itemsize = jnp.dtype(inputs.dtype).itemsize
    tn = _pick_block_rows(n, d, itemsize)

    num_blocks = pl.cdiv(n, tn)
    n_pad = num_blocks * tn
    if n_pad != n:
        # Zero rows have zero centered norms -> pcc = 0; they do not perturb the sum,
        # and we divide by the original N below.
        pad = ((0, n_pad - n), (0, 0))
        inputs = jnp.pad(inputs, pad)
        targets = jnp.pad(targets, pad)

    kernel = functools.partial(_pcc_partial_kernel, eps=float(eps))

    partials = pl.pallas_call(
        kernel,
        out_shape=jax.ShapeDtypeStruct((num_blocks, 1), jnp.float32),
        grid_spec=pltpu.PrefetchScalarGridSpec(
            num_scalar_prefetch=0,
            grid=(num_blocks,),
            in_specs=[
                pl.BlockSpec((tn, d), lambda i: (i, 0)),
                pl.BlockSpec((tn, d), lambda i: (i, 0)),
            ],
            out_specs=pl.BlockSpec((1, 1), lambda i: (i, 0)),
        ),
        compiler_params=pltpu.CompilerParams(
            # Each step writes its own output block -> shardable across TCs (v7x).
            dimension_semantics=("parallel",),
            # Room for the double-buffered input tiles; raises v5e's 16 MiB default,
            # stays inside v7x's 64 MiB physical VMEM.
            vmem_limit_bytes=32 << 20,
        ),
    )(inputs, targets)

    return 1.0 - jnp.sum(partials) / jnp.float32(n)


def _pearson_cc_loss_ref(inputs, targets, eps=1e-8):
    x = inputs.astype(jnp.float32)
    y = targets.astype(jnp.float32)
    xc = x - jnp.mean(x, axis=1, keepdims=True)
    yc = y - jnp.mean(y, axis=1, keepdims=True)
    w12 = jnp.sum(xc * yc, axis=1)
    n1 = jnp.maximum(jnp.sqrt(jnp.sum(xc * xc, axis=1)), eps)
    n2 = jnp.maximum(jnp.sqrt(jnp.sum(yc * yc, axis=1)), eps)
    pcc = w12 / (n1 * n2)
    return 1.0 - jnp.mean(pcc)


if __name__ == "__main__":
    key = jax.random.PRNGKey(0)

    # Case 1: small, well-aligned (N divisible by 8, D multiple of 128).
    k1, k2, k3, k4 = jax.random.split(key, 4)
    N1, D1 = 16, 128
    x1 = jax.random.normal(k1, (N1, D1), dtype=jnp.float32)
    y1 = 0.5 * x1 + jax.random.normal(k2, (N1, D1), dtype=jnp.float32)
    loss1 = jax.block_until_ready(pearson_cc_loss(x1, y1))
    ref1 = jax.block_until_ready(_pearson_cc_loss_ref(x1, y1))
    assert jnp.allclose(loss1, ref1, atol=1e-5, rtol=1e-5), (loss1, ref1)

    # Case 2: ragged N (exercises the zero-padding path).
    N2, D2 = 50, 256
    x2 = jax.random.normal(k3, (N2, D2), dtype=jnp.float32)
    y2 = -0.3 * x2 + jax.random.normal(k4, (N2, D2), dtype=jnp.float32)
    loss2 = jax.block_until_ready(pearson_cc_loss(x2, y2))
    ref2 = jax.block_until_ready(_pearson_cc_loss_ref(x2, y2))
    assert jnp.allclose(loss2, ref2, atol=1e-5, rtol=1e-5), (loss2, ref2)

    print("KERNEL_OK")
</pallas_src>

<mosaic_0001>
module attributes {stable_mosaic.version = 11 : i64} {
  func.func @_pcc_partial_kernel(%arg0: i32, %arg1: memref<16x128xf32, #tpu.memory_space<vmem>>, %arg2: memref<16x128xf32, #tpu.memory_space<vmem>>, %arg3: memref<1x1xf32, #tpu.memory_space<vmem>>) attributes {dimension_semantics = [#tpu.dimension_semantics<parallel>], iteration_bounds = array<i64: 1>, scalar_prefetch = 0 : i64, scratch_operands = 0 : i64, tpu.core_type = #tpu.core_type<tc>, window_params = [{transform_indices = @transform_0, window_bounds = array<i64: 16, 128>}, {transform_indices = @transform_1, window_bounds = array<i64: 16, 128>}, {transform_indices = @transform_2, window_bounds = array<i64: 1, 1>}]} {
    %c0 = arith.constant 0 : index
    %c0_0 = arith.constant 0 : index
    %0 = vector.load %arg1[%c0, %c0_0] : memref<16x128xf32, #tpu.memory_space<vmem>>, vector<16x128xf32>
    %c0_1 = arith.constant 0 : index
    %c0_2 = arith.constant 0 : index
    %1 = vector.load %arg2[%c0_1, %c0_2] : memref<16x128xf32, #tpu.memory_space<vmem>>, vector<16x128xf32>
    %cst = arith.constant dense<0.000000e+00> : vector<16xf32>
    %2 = vector.multi_reduction <add>, %0, %cst [1] : vector<16x128xf32> to vector<16xf32>
    %3 = vector.shape_cast %2 : vector<16xf32> to vector<16x1xf32>
    %cst_3 = arith.constant 1.280000e+02 : f32
    %4 = vector.broadcast %cst_3 : f32 to vector<16x1xf32>
    %5 = arith.divf %3, %4 : vector<16x1xf32>
    %6 = vector.broadcast %5 : vector<16x1xf32> to vector<16x128xf32>
    %7 = arith.subf %0, %6 : vector<16x128xf32>
    %cst_4 = arith.constant dense<0.000000e+00> : vector<16xf32>
    %8 = vector.multi_reduction <add>, %1, %cst_4 [1] : vector<16x128xf32> to vector<16xf32>
    %9 = vector.shape_cast %8 : vector<16xf32> to vector<16x1xf32>
    %cst_5 = arith.constant 1.280000e+02 : f32
    %10 = vector.broadcast %cst_5 : f32 to vector<16x1xf32>
    %11 = arith.divf %9, %10 : vector<16x1xf32>
    %12 = vector.broadcast %11 : vector<16x1xf32> to vector<16x128xf32>
    %13 = arith.subf %1, %12 : vector<16x128xf32>
    %14 = arith.mulf %7, %13 : vector<16x128xf32>
    %cst_6 = arith.constant dense<0.000000e+00> : vector<16xf32>
    %15 = vector.multi_reduction <add>, %14, %cst_6 [1] : vector<16x128xf32> to vector<16xf32>
    %16 = vector.shape_cast %15 : vector<16xf32> to vector<16x1xf32>
    %17 = arith.mulf %7, %7 : vector<16x128xf32>
    %cst_7 = arith.constant dense<0.000000e+00> : vector<16xf32>
    %18 = vector.multi_reduction <add>, %17, %cst_7 [1] : vector<16x128xf32> to vector<16xf32>
    %19 = vector.shape_cast %18 : vector<16xf32> to vector<16x1xf32>
    %20 = arith.mulf %13, %13 : vector<16x128xf32>
    %cst_8 = arith.constant dense<0.000000e+00> : vector<16xf32>
    %21 = vector.multi_reduction <add>, %20, %cst_8 [1] : vector<16x128xf32> to vector<16xf32>
    %22 = vector.shape_cast %21 : vector<16xf32> to vector<16x1xf32>
    %23 = math.sqrt %19 : vector<16x1xf32>
    %cst_9 = arith.constant 9.99999993E-9 : f32
    %24 = vector.broadcast %cst_9 : f32 to vector<16x1xf32>
    %25 = arith.maximumf %23, %24 : vector<16x1xf32>
    %26 = math.sqrt %22 : vector<16x1xf32>
    %cst_10 = arith.constant 9.99999993E-9 : f32
    %27 = vector.broadcast %cst_10 : f32 to vector<16x1xf32>
    %28 = arith.maximumf %26, %27 : vector<16x1xf32>
    %29 = arith.mulf %25, %28 : vector<16x1xf32>
    %30 = arith.divf %16, %29 : vector<16x1xf32>
    %31 = vector.shape_cast %30 : vector<16x1xf32> to vector<1x16x1xf32>
    %cst_11 = arith.constant dense<0.000000e+00> : vector<1xf32>
    %32 = vector.multi_reduction <add>, %31, %cst_11 [1, 2] : vector<1x16x1xf32> to vector<1xf32>
    %33 = vector.shape_cast %32 : vector<1xf32> to vector<1x1x1xf32>
    %34 = vector.extract %33[0, 0, 0] : f32 from vector<1x1x1xf32>
    %35 = vector.broadcast %34 : f32 to vector<1x1xf32>
    %c0_12 = arith.constant 0 : index
    %c0_13 = arith.constant 0 : index
    %36 = vector.load %arg3[%c0_12, %c0_13] : memref<1x1xf32, #tpu.memory_space<vmem>>, vector<1x1xf32>
    tpu.vector_store %arg3[%c0_12, %c0_13], %35 {strides = array<i32>} : memref<1x1xf32, #tpu.memory_space<vmem>>, vector<1x1xf32>,
    return
  }
  func.func @transform_0(%arg0: i32) -> (i32, i32) {
    %c0_i32 = arith.constant 0 : i32
    %c0_i32_0 = arith.constant 0 : i32
    return %arg0, %c0_i32 : i32, i32
  }
  func.func @transform_1(%arg0: i32) -> (i32, i32) {
    %c0_i32 = arith.constant 0 : i32
    %c0_i32_0 = arith.constant 0 : i32
    return %arg0, %c0_i32 : i32, i32
  }
  func.func @transform_2(%arg0: i32) -> (i32, i32) {
    %c0_i32 = arith.constant 0 : i32
    %c0_i32_0 = arith.constant 0 : i32
    return %arg0, %c0_i32 : i32, i32
  }
}

</mosaic_0001>

<bundles_post_ra>
// kernel: tpu_custom_call.1
= control target key start
LH: loop header
LB: loop body
LE: loop exit
PB: predicated region body
PF: predicated region fallthrough
CT: control target
= control target key end

     0   :  { %7 = vsyncpa [#allocation3], 0  ;;  %s296_s0 = inlined_call_operand.hbm [shape: f32[16,128], index: 0, kind: input, shape index: {}]   ;;  %s297_s1 = inlined_call_operand.hbm [shape: f32[16,128], index: 1, kind: input, shape index: {}]   ;;  %s298_s2 = inlined_call_operand.hbm [shape: f32[1,1], index: 2, kind: output, shape index: {}]  }
   0x1   :  { %8 = vsyncpa [#allocation6], 0 }
   0x2   :  { %9 = vsyncpa [#allocation4], 0  ;;  %s240_s9 = smov [#allocation2]   ;;  %s168_s13 = scalar_lea.hbm %s296_s0, 256 }
   0x3   :  { %s15_s10 = sshll.u32 %s240_s9, 4  ;;  %p169_p0 = scmp.ne.s32.totalorder %s296_s0, %s168_s13  ;;  %s16_s10 = int_to_ptr.vmem [resolvable:$true] %s15_s10 }
   0x4   :  { %p172_p1 = scmp.lt.u32.totalorder %s168_s13, %s296_s0 }
   0x6   :  { %p174_p2 = pnand %p172_p1, %p169_p0 }
   0x8   :  { %177 = shalt.err (!%p174_p2)
}
   0x9   :  { %s178_s18 = scalar_lea.vmem %s16_s10, 256  ;;  %p183_p4 = scmp.lt.s32.totalorder %s16_s10, %s16_s10 }
   0xa   :  { %p179_p3 = scmp.ne.s32.totalorder %s16_s10, %s178_s18  ;;  %p184_p5 = scmp.lt.s32.totalorder %s178_s18, %s178_s18 }
   0xc   :  { %p185_p6 = por %p184_p5, %p183_p4 }
   0xe   :  { %p186_p7 = pnand %p185_p6, %p179_p3 }
  0x10   :  { %189 = shalt.err (!%p186_p7)
}
  0x11   :  { %s241_s19 = smov 128   ;;  %s242_s20 = smov 8  }
  0x12   :  { %21 = dma.hbm_to_vmem [thread:$0]  %s296_s0, 256, %s16_s10, [#allocation3], %s241_s19, %s241_s19, %s242_s20  }
  0x13   :  { %s243_s23 = smov [#allocation5]   ;;  %s190_s27 = scalar_lea.hbm %s297_s1, 256 }
  0x14   :  { %s27_s24 = sshll.u32 %s243_s23, 4  ;;  %p191_p8 = scmp.ne.s32.totalorder %s297_s1, %s190_s27  ;;  %s28_s24 = int_to_ptr.vmem [resolvable:$true] %s27_s24 }
  0x15   :  { %p194_p9 = scmp.lt.u32.totalorder %s190_s27, %s297_s1 }
  0x17   :  { %p196_p10 = pnand %p194_p9, %p191_p8 }
  0x19   :  { %199 = shalt.err (!%p196_p10)
}
  0x1a   :  { %s200_s4 = scalar_lea.vmem %s28_s24, 256  ;;  %p205_p12 = scmp.lt.s32.totalorder %s28_s24, %s28_s24 }
  0x1b   :  { %p201_p11 = scmp.ne.s32.totalorder %s28_s24, %s200_s4  ;;  %p206_p13 = scmp.lt.s32.totalorder %s200_s4, %s200_s4 }
  0x1d   :  { %p207_p0 = por %p206_p13, %p205_p12 }
  0x1f   :  { %p208_p1 = pnand %p207_p0, %p201_p11 }
  0x21   :  { %211 = shalt.err (!%p208_p1)
}
  0x22   :  { %33 = dma.hbm_to_vmem [thread:$0]  %s297_s1, 256, %s28_s24, [#allocation6], %s241_s19, %s241_s19, %s242_s20  }
  0x23   :  { %234 = dma.done.wait [#allocation3], 256  }
  0x24   :  { %235 = vsyncadd [#allocation3], 4294967040 }
  0x25   :  { %236 = dma.done.wait [#allocation6], 256  }
  0x26   :  { %237 = vsyncadd [#allocation6], 4294967040  ;;  %v42_v0 = vld [vmem:[#allocation5] sm:$0xff]  ;;  %v40_v1 = vld [vmem:[#allocation2] sm:$0xff]  ;;  %vm117_vm8 = vcmask 7168   ;;  %s244_s1 = smov [#allocation7]  }
  0x27   :  { %53 = vadd.xlane.f32.xlu1 %v42_v0  ;;  %44 = vadd.xlane.f32.xlu0 %v40_v1  ;;  %v43_v2 = vld [vmem:[#allocation5 + $0x8] sm:$0xff]  ;;  %v41_v3 = vld [vmem:[#allocation2 + $0x8] sm:$0xff]  ;;  %s139_s6 = sshll.u32 %s244_s1, 4  ;;  %vm131_vm9 = vcmask 0   ;;  %s140_s6 = int_to_ptr.vmem [resolvable:$true] %s139_s6 }
  0x28   :  { %s212_s8 = scalar_lea.vmem %s140_s6, 16  ;;  %s216_s9 = scalar_lea.vmem %s140_s6, 32 }
  0x29   :  { %p213_p2 = scmp.ne.s32.totalorder %s140_s6, %s212_s8  ;;  %p217_p3 = scmp.lt.s32.totalorder %s140_s6, %s140_s6 }
  0x2a   :  { %p218_p4 = scmp.lt.s32.totalorder %s216_s9, %s212_s8 }
  0x2b   :  { %55 = vadd.xlane.f32.xlu1 %v43_v2  ;;  %46 = vadd.xlane.f32.xlu0 %v41_v3 }
  0x2c   :  { %p219_p5 = por %p218_p4, %p217_p3 }
  0x2e   :  { %p220_p6 = pnand %p219_p5, %p213_p2 }
  0xb4   :  { %v54_v4 = vpop.xlane.xlu1 %53  ;;  %v45_v5 = vpop.xlane.xlu0 %44 }
  0xb5   :  { %v57_v6 = vmul.f32 0.0078125, %v54_v4  ;;  %v49_v7 = vmul.f32 0.0078125, %v45_v5 }
  0xb7   :  { %v51_v8 = vsub.f32 %v40_v1, %v49_v7  ;;  %v59_v11 = vsub.f32 %v42_v0, %v57_v6 }
  0xb8   :  { %v56_v9 = vpop.xlane.xlu1 %55  ;;  %v47_v10 = vpop.xlane.xlu0 %46 }
  0xb9   :  { %v58_v12 = vmul.f32 0.0078125, %v56_v9  ;;  %v50_v13 = vmul.f32 0.0078125, %v47_v10  ;;  %v67_v14 = vmul.f32 %v51_v8, %v51_v8  ;;  %v73_v16 = vmul.f32 %v59_v11, %v59_v11 }
  0xba   :  { %v61_v20 = vmul.f32 %v59_v11, %v51_v8 }
  0xbb   :  { %v52_v15 = vsub.f32 %v41_v3, %v50_v13  ;;  %69 = vadd.xlane.f32.xlu0 %v67_v14  ;;  %v60_v17 = vsub.f32 %v43_v2, %v58_v12 }
  0xbd   :  { %v68_v18 = vmul.f32 %v52_v15, %v52_v15  ;;  %v74_v19 = vmul.f32 %v60_v17, %v60_v17  ;;  %v62_v21 = vmul.f32 %v60_v17, %v52_v15 }
  0xbf   :  { %75 = vadd.xlane.f32.xlu0 %v73_v16  ;;  %71 = vadd.xlane.f32.xlu1 %v68_v18 }
  0xc3   :  { %63 = vadd.xlane.f32.xlu0 %v61_v20  ;;  %77 = vadd.xlane.f32.xlu1 %v74_v19 }
  0xc7   :  { %65 = vadd.xlane.f32.xlu1 %v62_v21 }
 0x148   :  { %v70_v22 = vpop.xlane.xlu0 %69 }
 0x149   :  { %156 = vrsqrt.f32 %v70_v22  ;;  %vm81_vm0 = vcmp.eq.f32.partialorder %v70_v22, inf  ;;  %v84_v31 = vand.u32 2147483648, %v70_v22  ;;  %vm83_vm1 = vcmp.eq.f32.partialorder %v70_v22, 0.0 }
 0x14c   :  { %v72_v23 = vpop.xlane.xlu1 %71  ;;  %v76_v24 = vpop.xlane.xlu0 %75 }
 0x14d   :  { %158 = vrsqrt.f32 %v72_v23  ;;  %vm88_vm2 = vcmp.eq.f32.partialorder %v72_v23, inf  ;;  %vm97_vm3 = vcmp.eq.f32.partialorder %v76_v24, inf  ;;  %v100_v36 = vand.u32 2147483648, %v76_v24 }
 0x14e   :  { %160 = vrsqrt.f32 %v76_v24  ;;  %v91_v38 = vand.u32 2147483648, %v72_v23  ;;  %vm99_vm4 = vcmp.eq.f32.partialorder %v76_v24, 0.0  ;;  %vm90_vm5 = vcmp.eq.f32.partialorder %v72_v23, 0.0 }
 0x150   :  { %v78_v25 = vpop.xlane.xlu1 %77  ;;  %v64_v53 = vpop.xlane.xlu0 %63 }
 0x151   :  { %162 = vrsqrt.f32 %v78_v25  ;;  %vm104_vm6 = vcmp.eq.f32.partialorder %v78_v25, inf  ;;  %v107_v43 = vand.u32 2147483648, %v78_v25  ;;  %vm106_vm7 = vcmp.eq.f32.partialorder %v78_v25, 0.0 }
 0x153   :  { %v157_v26 = vpop.eup %156 }
 0x154   :  { %v80_v27 = vmul.f32 %v157_v26, %v70_v22  ;;  %v66_v56 = vpop.xlane.xlu1 %65 }
 0x156   :  { %v82_v29 = vsel %vm81_vm0, %v70_v22, %v80_v27 }
 0x157   :  { %v159_v28 = vpop.eup %158  ;;  %v85_v34 = vsel %vm83_vm1, %v84_v31, %v82_v29 }
 0x158   :  { %v161_v30 = vpop.eup %160  ;;  %v87_v32 = vmul.f32 %v159_v28, %v72_v23  ;;  %v93_v44 = vmax.f32 %v85_v34, 1e-08 }
 0x159   :  { %v96_v33 = vmul.f32 %v161_v30, %v76_v24 }
 0x15a   :  { %v89_v35 = vsel %vm88_vm2, %v72_v23, %v87_v32 }
 0x15b   :  { %v163_v37 = vpop.eup %162  ;;  %v98_v39 = vsel %vm97_vm3, %v76_v24, %v96_v33  ;;  %v92_v42 = vsel %vm90_vm5, %v91_v38, %v89_v35 }
 0x15c   :  { %v101_v40 = vsel %vm99_vm4, %v100_v36, %v98_v39  ;;  %v103_v41 = vmul.f32 %v163_v37, %v78_v25  ;;  %v94_v49 = vmax.f32 %v92_v42, 1e-08 }
 0x15d   :  { %v109_v45 = vmax.f32 %v101_v40, 1e-08 }
 0x15e   :  { %v105_v46 = vsel %vm104_vm6, %v78_v25, %v103_v41 }
 0x15f   :  { %v108_v47 = vsel %vm106_vm7, %v107_v43, %v105_v46  ;;  %v111_v48 = vmul.f32 %v109_v45, %v93_v44 }
 0x160   :  { %v110_v50 = vmax.f32 %v108_v47, 1e-08 }
 0x161   :  { %164 = vrcp.f32 %v111_v48 }
 0x162   :  { %v112_v51 = vmul.f32 %v110_v50, %v94_v49 }
 0x164   :  { %166 = vrcp.f32 %v112_v51 }
 0x16b   :  { %v165_v52 = vpop.eup %164 }
 0x16c   :  { %v114_v54 = vmul.f32 %v165_v52, %v64_v53 }
 0x16e   :  { %v167_v55 = vpop.eup %166  ;;  %v118_v58 = vsel %vm117_vm8, %v114_v54, 0.0 }
 0x16f   :  { %v116_v57 = vmul.f32 %v167_v55, %v66_v56 }
 0x171   :  { %v119_v59 = vsel %vm117_vm8, %v116_v57, 0.0 }
 0x172   :  { %v120_v60 = vadd.f32 %v119_v59, %v118_v58 }
 0x174   :  { %121 = vadd.xlane.f32.xlu0 %v120_v60 }
 0x201   :  { %v122_v61 = vpop.xlane.xlu0 %121 }
 0x202   :  { %v123_v62 = vrot.slane %v122_v61, 4 }
 0x204   :  { %v124_v63 = vadd.f32 %v123_v62, %v122_v61 }
 0x206   :  { %v125_v0 = vrot.slane %v124_v63, 2 }
 0x208   :  { %v126_v1 = vadd.f32 %v125_v0, %v124_v63 }
 0x20a   :  { %v127_v2 = vrot.slane %v126_v1, 1 }
 0x20c   :  { %v128_v3 = vadd.f32 %v127_v2, %v126_v1 }
 0x20e   :  { %149 = vpush %v128_v3 }
 0x23f   :  { %s150_s7 = spop %149 }
 0x240   :  { %v130_v4 = vstv %s150_s7 }
 0x241   :  { %132 = vst.msk [vmem:[#allocation7] sm:$0x1] %vm131_vm9, %v130_v4 }
 0x242   :  { %223 = shalt.err (!%p220_p6)
}
 0x243   :  { %s224_s12 = scalar_lea.hbm %s298_s2, 16 }
 0x244   :  { %p225_p7 = scmp.ne.s32.totalorder %s298_s2, %s224_s12  ;;  %p228_p8 = scmp.lt.u32.totalorder %s224_s12, %s298_s2 }
 0x246   :  { %p230_p9 = pnand %p228_p8, %p225_p7 }
 0x248   :  { %233 = shalt.err (!%p230_p9)
}
 0x249   :  { %142 = dma.vmem_to_hbm [thread:$0]  %s140_s6, 16, %s298_s2, [#allocation4]  }
 0x24a   :  { %238 = dma.done.wait [#allocation4], 16  }
 0x24b   :  { %239 = vsyncadd [#allocation4], 4294967280 }
 0x24c   :  { %146 = vsyncpa [#allocation3], 1 }
 0x24d   :  { %147 = vsyncpa [#allocation6], 1 }
 0x24e   :  { %148 = vsyncpa [#allocation4], 1 }

</bundles_post_ra>
